<compile_context>
chip_gen: v7x
topology: tpu7x:2x2x1
jax: 0.10.0
libtpu: 0.0.40
codegen_flags: <defaults>
</compile_context>

<pallas_src>
import functools
import math

import jax
import jax.numpy as jnp
from jax.experimental import pallas as pl
from jax.experimental.pallas import tpu as pltpu


# --------------------------- VMEM budgeting helpers ---------------------------

def _round_up(x, m):
    return (x + m - 1) // m * m


def _tile_bytes(shape, dtype):
    """Conservative VMEM bytes for one resident block (pad last dims to 8x128)."""
    s = list(shape)
    if len(s) >= 1:
        s[-1] = _round_up(max(s[-1], 1), 128)
    if len(s) >= 2:
        s[-2] = _round_up(max(s[-2], 1), 8)
    n = 1
    for d in s:
        n *= d
    return n * jnp.dtype(dtype).itemsize


def _vmem_limit(io_blocks, scratch_blocks):
    """Double-buffered I/O blocks + scratch + headroom, clamped to [16, 64] MiB
    (64 MiB = v7x physical VMEM per TensorCore)."""
    est = sum(2 * _tile_bytes(s, d) for s, d in io_blocks)
    est += sum(_tile_bytes(s, d) for s, d in scratch_blocks)
    est += 2 * 1024 * 1024
    return int(min(max(est, 16 * 1024 * 1024), 64 * 1024 * 1024))


# ----------------------------- Kernel 1: K/V projection -----------------------------

def _kv_proj_kernel(x_ref, wk_ref, wv_ref, k_out_ref, v_out_ref):
    # x_ref:  (1, ts, C)   sequence tile of one batch element
    # wk_ref: (1, C, hd)   per-head K weight slice
    # wv_ref: (1, C, hd)   per-head V weight slice
    # outs:   (1, 1, ts, hd)
    xt = x_ref[0]
    k = jnp.dot(xt, wk_ref[0], preferred_element_type=jnp.float32)
    v = jnp.dot(xt, wv_ref[0], preferred_element_type=jnp.float32)
    k_out_ref[0, 0] = k.astype(k_out_ref.dtype)
    v_out_ref[0, 0] = v.astype(v_out_ref.dtype)


# ------------------- Kernel 2: fused Q-proj + flash attention + out-proj -------------------

def _flash_attn_proj_kernel(xq_ref, wq_ref, k_ref, v_ref, wo_ref, bo_ref,
                            o_ref,
                            q_sc, m_sc, l_sc, pv_sc, out_sc, *, scale):
    # Grid: (batch, q_tile, head, kv_tile); (head, kv_tile) are reduction axes.
    h = pl.program_id(2)
    ki = pl.program_id(3)
    last_h = pl.num_programs(2) - 1
    last_k = pl.num_programs(3) - 1

    # Zero the output-projection accumulator once per (batch, q_tile).
    @pl.when(jnp.logical_and(h == 0, ki == 0))
    def _():
        out_sc[...] = jnp.zeros(out_sc.shape, jnp.float32)

    # Start of a new head: compute Q once, fold the softmax scale into it,
    # and reset the online-softmax state.
    @pl.when(ki == 0)
    def _():
        q = jnp.dot(xq_ref[0], wq_ref[0], preferred_element_type=jnp.float32)
        q_sc[...] = q * scale                                  # scale on (tq, hd)
        m_sc[...] = jnp.full(m_sc.shape, -jnp.inf, jnp.float32)
        l_sc[...] = jnp.zeros(l_sc.shape, jnp.float32)
        pv_sc[...] = jnp.zeros(pv_sc.shape, jnp.float32)

    kt = k_ref[0, 0]                                           # (tk, hd), compute dtype
    vt = v_ref[0, 0]                                           # (tk, hd)
    q = q_sc[...].astype(kt.dtype)                             # bf16 MXU operands if enabled

    # scores for this kv tile (contract on hd, no explicit transpose)
    s = jax.lax.dot_general(q, kt, (((1,), (1,)), ((), ())),
                            preferred_element_type=jnp.float32)  # (tq, tk), f32

    # online (flash) softmax update — statistics stay f32
    m_new = jnp.maximum(m_sc[...], jnp.max(s, axis=-1, keepdims=True))
    alpha = jnp.exp(m_sc[...] - m_new)
    p = jnp.exp(s - m_new)                                     # unnormalized probabilities
    l_sc[...] = alpha * l_sc[...] + jnp.sum(p, axis=-1, keepdims=True)
    pv_sc[...] = alpha * pv_sc[...] + jnp.dot(p.astype(vt.dtype), vt,
                                              preferred_element_type=jnp.float32)
    m_sc[...] = m_new

    # End of kv loop for this head: deferred normalization ((tq, hd) multiply +
    # EUP reciprocal) and fold this head's block of the output projection.
    @pl.when(ki == last_k)
    def _():
        wo = wo_ref[0]                                         # (hd, C)
        oh = pv_sc[...] * pl.reciprocal(l_sc[...], approx=True)
        out_sc[...] += jnp.dot(oh.astype(wo.dtype), wo,
                               preferred_element_type=jnp.float32)

    # Last head, last kv tile: add bias and emit the (tq, C) output tile.
    @pl.when(jnp.logical_and(h == last_h, ki == last_k))
    def _():
        o_ref[0] = (out_sc[...] + bo_ref[...]).astype(o_ref.dtype)


# ----------------------------- Wrapper -----------------------------

def attention_forward(x, w_qkv, w_out, b_out, *, heads,
                      q_tile=None, kv_tile=None, compute_dtype=None):
    """x: (B, N, C); w_qkv: (C, 3C) (= W_qkv^T); w_out: (C, C) (= W_out^T); b_out: (C,)."""
    b, n, c = x.shape
    assert c % heads == 0, "dim must be divisible by heads"
    hd = c // heads
    scale = 1.0 / (c ** 0.5)       # PyTorch module: 1/sqrt(dim), NOT 1/sqrt(head_dim)

    out_dtype = x.dtype
    cdt = compute_dtype if compute_dtype is not None else x.dtype

    if q_tile is None:
        q_tile = n if n <= 128 else 128
    if kv_tile is None:
        kv_tile = n if n <= 128 else 128
    assert n % q_tile == 0 and (q_tile % 8 == 0 or q_tile == n)
    assert n % kv_tile == 0 and (kv_tile % 8 == 0 or kv_tile == n)
    nq, nk = n // q_tile, n // kv_tile

    # Per-head weight layouts (done once, outside the kernels) so every in-kernel
    # tile is lane-contiguous — no sub-128-lane slicing of a fused (N, 3C) qkv.
    w_q = w_qkv[:, 0 * c:1 * c].reshape(c, heads, hd).transpose(1, 0, 2)   # (H, C, hd)
    w_k = w_qkv[:, 1 * c:2 * c].reshape(c, heads, hd).transpose(1, 0, 2)   # (H, C, hd)
    w_v = w_qkv[:, 2 * c:3 * c].reshape(c, heads, hd).transpose(1, 0, 2)   # (H, C, hd)
    w_o = w_out.reshape(heads, hd, c)                                      # (H, hd, C)

    # bf16 MXU operands (f32 accumulation) if requested; bias stays f32.
    x_c = x.astype(cdt)
    w_q = w_q.astype(cdt)
    w_k = w_k.astype(cdt)
    w_v = w_v.astype(cdt)
    w_o = w_o.astype(cdt)
    b_o = b_out.reshape(1, c).astype(jnp.float32)

    # ---------------- K/V projection (tiled, per head, lane-contiguous output) ----------------
    kv_io = [((1, kv_tile, c), cdt), ((1, c, hd), cdt), ((1, c, hd), cdt),
             ((1, 1, kv_tile, hd), cdt), ((1, 1, kv_tile, hd), cdt)]
    k_all, v_all = pl.pallas_call(
        _kv_proj_kernel,
        out_shape=(jax.ShapeDtypeStruct((b, heads, n, hd), cdt),
                   jax.ShapeDtypeStruct((b, heads, n, hd), cdt)),
        grid=(b, nk, heads),
        in_specs=[
            pl.BlockSpec((1, kv_tile, c), lambda bi, si, h: (bi, si, 0)),
            pl.BlockSpec((1, c, hd), lambda bi, si, h: (h, 0, 0)),
            pl.BlockSpec((1, c, hd), lambda bi, si, h: (h, 0, 0)),
        ],
        out_specs=(
            pl.BlockSpec((1, 1, kv_tile, hd), lambda bi, si, h: (bi, h, si, 0)),
            pl.BlockSpec((1, 1, kv_tile, hd), lambda bi, si, h: (bi, h, si, 0)),
        ),
        compiler_params=pltpu.CompilerParams(
            dimension_semantics=("parallel", "parallel", "parallel"),
            vmem_limit_bytes=_vmem_limit(kv_io, [])),
    )(x_c, w_k, w_v)

    # ---------------- Fused Q-projection + flash attention + output projection ----------------
    attn_io = [((1, q_tile, c), cdt), ((1, c, hd), cdt),
               ((1, 1, kv_tile, hd), cdt), ((1, 1, kv_tile, hd), cdt),
               ((1, hd, c), cdt), ((1, c), jnp.float32), ((1, q_tile, c), out_dtype)]
    attn_scratch = [((q_tile, hd), jnp.float32), ((q_tile, 1), jnp.float32),
                    ((q_tile, 1), jnp.float32), ((q_tile, hd), jnp.float32),
                    ((q_tile, c), jnp.float32)]
    kern = functools.partial(_flash_attn_proj_kernel, scale=scale)
    out = pl.pallas_call(
        kern,
        out_shape=jax.ShapeDtypeStruct((b, n, c), out_dtype),
        grid=(b, nq, heads, nk),
        in_specs=[
            pl.BlockSpec((1, q_tile, c), lambda bi, qi, h, ki: (bi, qi, 0)),
            pl.BlockSpec((1, c, hd), lambda bi, qi, h, ki: (h, 0, 0)),
            pl.BlockSpec((1, 1, kv_tile, hd), lambda bi, qi, h, ki: (bi, h, ki, 0)),
            pl.BlockSpec((1, 1, kv_tile, hd), lambda bi, qi, h, ki: (bi, h, ki, 0)),
            pl.BlockSpec((1, hd, c), lambda bi, qi, h, ki: (h, 0, 0)),
            pl.BlockSpec((1, c), lambda bi, qi, h, ki: (0, 0)),
        ],
        out_specs=pl.BlockSpec((1, q_tile, c), lambda bi, qi, h, ki: (bi, qi, 0)),
        scratch_shapes=[
            pltpu.VMEM((q_tile, hd), jnp.float32),   # scaled Q tile (per head)
            pltpu.VMEM((q_tile, 1), jnp.float32),    # running max
            pltpu.VMEM((q_tile, 1), jnp.float32),    # running denominator
            pltpu.VMEM((q_tile, hd), jnp.float32),   # running P @ V
            pltpu.VMEM((q_tile, c), jnp.float32),    # output-projection accumulator
        ],
        compiler_params=pltpu.CompilerParams(
            dimension_semantics=("parallel", "parallel", "arbitrary", "arbitrary"),
            vmem_limit_bytes=_vmem_limit(attn_io, attn_scratch)),
    )(x_c, w_q, k_all, v_all, w_o, b_o)
    return out


# ----------------------------- Pure-JAX reference -----------------------------

def attention_ref(x, w_qkv, w_out, b_out, *, heads):
    b, n, c = x.shape
    hd = c // heads
    scale = 1.0 / (c ** 0.5)
    qkv = jnp.einsum("bnc,cd->bnd", x, w_qkv).reshape(b, n, 3, heads, hd)
    q, k, v = jnp.transpose(qkv, (2, 0, 3, 1, 4))                 # (B, H, N, hd)
    dot = jnp.einsum("bhqd,bhkd->bhqk", q, k) * scale
    attn = jax.nn.softmax(dot, axis=-1)
    y = jnp.einsum("bhqk,bhkd->bhqd", attn, v)
    y = jnp.transpose(y, (0, 2, 1, 3)).reshape(b, n, c)
    return jnp.einsum("bnc,cd->bnd", y, w_out) + b_out


# ----------------------------- Main -----------------------------

if __name__ == "__main__":
    # Small demo shapes (N=16 so the kernel exercises 2 q-tiles x 2 kv-tiles x 4 heads).
    # TODO(synk): benchmark/tune at realistic shapes (N>=512, C mult of 128, hd 64-128).
    batch, seq, dim, heads = 2, 16, 32, 4

    key = jax.random.PRNGKey(0)
    kx, kq, kw, kb = jax.random.split(key, 4)
    x = jax.random.normal(kx, (batch, seq, dim), jnp.float32)
    w_qkv = jax.random.normal(kq, (dim, 3 * dim), jnp.float32) / math.sqrt(dim)
    w_out = jax.random.normal(kw, (dim, dim), jnp.float32) / math.sqrt(dim)
    b_out = jax.random.normal(kb, (dim,), jnp.float32) / math.sqrt(dim)

    y_ref = attention_ref(x, w_qkv, w_out, b_out, heads=heads)

    # f32 MXU path (tight-ish check; only diffs are online-softmax reassociation
    # and the approximate EUP reciprocal used for the deferred normalization).
    fwd_f32 = jax.jit(functools.partial(attention_forward, heads=heads,
                                        q_tile=8, kv_tile=8,
                                        compute_dtype=jnp.float32))
    y_f32 = fwd_f32(x, w_qkv, w_out, b_out)
    jax.block_until_ready(y_f32)
    assert y_f32.shape == (batch, seq, dim), y_f32.shape
    err_f32 = float(jnp.max(jnp.abs(y_f32 - y_ref)))
    assert err_f32 < 5e-2, f"f32 path mismatch vs reference: {err_f32}"

    # bf16 MXU-operand path (f32 accumulation) — looser tolerance.
    fwd_bf16 = jax.jit(functools.partial(attention_forward, heads=heads,
                                         q_tile=8, kv_tile=8,
                                         compute_dtype=jnp.bfloat16))
    y_bf16 = fwd_bf16(x, w_qkv, w_out, b_out)
    jax.block_until_ready(y_bf16)
    err_bf16 = float(jnp.max(jnp.abs(y_bf16.astype(jnp.float32) - y_ref)))
    assert err_bf16 < 2e-1, f"bf16 path mismatch vs reference: {err_bf16}"

    print("KERNEL_OK")
</pallas_src>

<mosaic_0001>
module attributes {stable_mosaic.version = 11 : i64} {
  func.func @_kv_proj_kernel(%arg0: i32, %arg1: i32, %arg2: i32, %arg3: memref<1x8x32xf32, #tpu.memory_space<vmem>>, %arg4: memref<1x32x8xf32, #tpu.memory_space<vmem>>, %arg5: memref<1x32x8xf32, #tpu.memory_space<vmem>>, %arg6: memref<1x1x8x8xf32, #tpu.memory_space<vmem>>, %arg7: memref<1x1x8x8xf32, #tpu.memory_space<vmem>>) attributes {dimension_semantics = [#tpu.dimension_semantics<parallel>, #tpu.dimension_semantics<parallel>, #tpu.dimension_semantics<parallel>], iteration_bounds = array<i64: 2, 2, 4>, scalar_prefetch = 0 : i64, scratch_operands = 0 : i64, tpu.core_type = #tpu.core_type<tc>, window_params = [{transform_indices = @transform_0, window_bounds = array<i64: 1, 8, 32>}, {transform_indices = @transform_1, window_bounds = array<i64: 1, 32, 8>}, {transform_indices = @transform_2, window_bounds = array<i64: 1, 32, 8>}, {transform_indices = @transform_3, window_bounds = array<i64: 1, 1, 8, 8>}, {transform_indices = @transform_4, window_bounds = array<i64: 1, 1, 8, 8>}]} {
    %c0 = arith.constant 0 : index
    %c0_0 = arith.constant 0 : index
    %c0_1 = arith.constant 0 : index
    %0 = vector.load %arg3[%c0, %c0_0, %c0_1] : memref<1x8x32xf32, #tpu.memory_space<vmem>>, vector<1x8x32xf32>
    %1 = vector.shape_cast %0 : vector<1x8x32xf32> to vector<8x32xf32>
    %c0_2 = arith.constant 0 : index
    %c0_3 = arith.constant 0 : index
    %c0_4 = arith.constant 0 : index
    %2 = vector.load %arg4[%c0_2, %c0_3, %c0_4] : memref<1x32x8xf32, #tpu.memory_space<vmem>>, vector<1x32x8xf32>
    %3 = vector.shape_cast %2 : vector<1x32x8xf32> to vector<32x8xf32>
    %cst = arith.constant dense<0.000000e+00> : vector<8x8xf32>
    %4 = tpu.matmul %1, %3, %cst {dimension_numbers = #tpu.dot_dimension_numbers<[1], [0], [0], [1], [0, 0, 1, 1], [], []>} : vector<8x32xf32>, vector<32x8xf32>, vector<8x8xf32> -> vector<8x8xf32>
    %c0_5 = arith.constant 0 : index
    %c0_6 = arith.constant 0 : index
    %c0_7 = arith.constant 0 : index
    %5 = vector.load %arg5[%c0_5, %c0_6, %c0_7] : memref<1x32x8xf32, #tpu.memory_space<vmem>>, vector<1x32x8xf32>
    %6 = vector.shape_cast %5 : vector<1x32x8xf32> to vector<32x8xf32>
    %cst_8 = arith.constant dense<0.000000e+00> : vector<8x8xf32>
    %7 = tpu.matmul %1, %6, %cst_8 {dimension_numbers = #tpu.dot_dimension_numbers<[1], [0], [0], [1], [0, 0, 1, 1], [], []>} : vector<8x32xf32>, vector<32x8xf32>, vector<8x8xf32> -> vector<8x8xf32>
    %c0_9 = arith.constant 0 : index
    %c0_10 = arith.constant 0 : index
    %c0_11 = arith.constant 0 : index
    %c0_12 = arith.constant 0 : index
    %8 = vector.load %arg6[%c0_9, %c0_10, %c0_11, %c0_12] : memref<1x1x8x8xf32, #tpu.memory_space<vmem>>, vector<1x1x8x8xf32>
    %9 = vector.shape_cast %8 : vector<1x1x8x8xf32> to vector<8x8xf32>
    %10 = vector.shape_cast %4 : vector<8x8xf32> to vector<1x1x8x8xf32>
    tpu.vector_store %arg6[%c0_9, %c0_10, %c0_11, %c0_12], %10 {strides = array<i32>} : memref<1x1x8x8xf32, #tpu.memory_space<vmem>>, vector<1x1x8x8xf32>,
    %c0_13 = arith.constant 0 : index
    %c0_14 = arith.constant 0 : index
    %c0_15 = arith.constant 0 : index
    %c0_16 = arith.constant 0 : index
    %11 = vector.load %arg7[%c0_13, %c0_14, %c0_15, %c0_16] : memref<1x1x8x8xf32, #tpu.memory_space<vmem>>, vector<1x1x8x8xf32>
    %12 = vector.shape_cast %11 : vector<1x1x8x8xf32> to vector<8x8xf32>
    %13 = vector.shape_cast %7 : vector<8x8xf32> to vector<1x1x8x8xf32>
    tpu.vector_store %arg7[%c0_13, %c0_14, %c0_15, %c0_16], %13 {strides = array<i32>} : memref<1x1x8x8xf32, #tpu.memory_space<vmem>>, vector<1x1x8x8xf32>,
    return
  }
  func.func @transform_0(%arg0: i32, %arg1: i32, %arg2: i32) -> (i32, i32, i32) {
    %c0_i32 = arith.constant 0 : i32
    %c0_i32_0 = arith.constant 0 : i32
    return %arg0, %arg1, %c0_i32 : i32, i32, i32
  }
  func.func @transform_1(%arg0: i32, %arg1: i32, %arg2: i32) -> (i32, i32, i32) {
    %c0_i32 = arith.constant 0 : i32
    %c0_i32_0 = arith.constant 0 : i32
    %c0_i32_1 = arith.constant 0 : i32
    return %arg2, %c0_i32, %c0_i32_0 : i32, i32, i32
  }
  func.func @transform_2(%arg0: i32, %arg1: i32, %arg2: i32) -> (i32, i32, i32) {
    %c0_i32 = arith.constant 0 : i32
    %c0_i32_0 = arith.constant 0 : i32
    %c0_i32_1 = arith.constant 0 : i32
    return %arg2, %c0_i32, %c0_i32_0 : i32, i32, i32
  }
  func.func @transform_3(%arg0: i32, %arg1: i32, %arg2: i32) -> (i32, i32, i32, i32) {
    %c0_i32 = arith.constant 0 : i32
    %c0_i32_0 = arith.constant 0 : i32
    return %arg0, %arg2, %arg1, %c0_i32 : i32, i32, i32, i32
  }
  func.func @transform_4(%arg0: i32, %arg1: i32, %arg2: i32) -> (i32, i32, i32, i32) {
    %c0_i32 = arith.constant 0 : i32
    %c0_i32_0 = arith.constant 0 : i32
    return %arg0, %arg2, %arg1, %c0_i32 : i32, i32, i32, i32
  }
}

module attributes {stable_mosaic.version = 11 : i64} {
  func.func @_flash_attn_proj_kernel(%arg0: i32, %arg1: i32, %arg2: i32, %arg3: i32, %arg4: memref<1x8x32xf32, #tpu.memory_space<vmem>>, %arg5: memref<1x32x8xf32, #tpu.memory_space<vmem>>, %arg6: memref<1x1x8x8xf32, #tpu.memory_space<vmem>>, %arg7: memref<1x1x8x8xf32, #tpu.memory_space<vmem>>, %arg8: memref<1x8x32xf32, #tpu.memory_space<vmem>>, %arg9: memref<1x32xf32, #tpu.memory_space<vmem>>, %arg10: memref<1x8x32xf32, #tpu.memory_space<vmem>>, %arg11: memref<8x8xf32, #tpu.memory_space<vmem>>, %arg12: memref<8x1xf32, #tpu.memory_space<vmem>>, %arg13: memref<8x1xf32, #tpu.memory_space<vmem>>, %arg14: memref<8x8xf32, #tpu.memory_space<vmem>>, %arg15: memref<8x32xf32, #tpu.memory_space<vmem>>) attributes {dimension_semantics = [#tpu.dimension_semantics<parallel>, #tpu.dimension_semantics<parallel>, #tpu.dimension_semantics<arbitrary>, #tpu.dimension_semantics<arbitrary>], iteration_bounds = array<i64: 2, 2, 4, 2>, scalar_prefetch = 0 : i64, scratch_operands = 5 : i64, tpu.core_type = #tpu.core_type<tc>, window_params = [{transform_indices = @transform_0, window_bounds = array<i64: 1, 8, 32>}, {transform_indices = @transform_1, window_bounds = array<i64: 1, 32, 8>}, {transform_indices = @transform_2, window_bounds = array<i64: 1, 1, 8, 8>}, {transform_indices = @transform_3, window_bounds = array<i64: 1, 1, 8, 8>}, {transform_indices = @transform_4, window_bounds = array<i64: 1, 8, 32>}, {pipeline_mode = #tpu.pipeline_mode<synchronous>, transform_indices = @transform_5, window_bounds = array<i64: 1, 32>}, {transform_indices = @transform_6, window_bounds = array<i64: 1, 8, 32>}]} {
    %c0_i32 = arith.constant 0 : i32
    %0 = arith.cmpi eq, %arg2, %c0_i32 : i32
    %c0_i32_0 = arith.constant 0 : i32
    %1 = arith.cmpi eq, %arg3, %c0_i32_0 : i32
    %2 = arith.andi %0, %1 : i1
    %3 = arith.extui %2 : i1 to i32
    %c0_i32_1 = arith.constant 0 : i32
    %4 = arith.cmpi ne, %3, %c0_i32_1 : i32
    scf.if %4 {
      %cst_33 = arith.constant 0.000000e+00 : f32
      %45 = vector.broadcast %cst_33 : f32 to vector<8x32xf32>
      %c0_34 = arith.constant 0 : index
      %c0_35 = arith.constant 0 : index
      %46 = vector.load %arg15[%c0_34, %c0_35] : memref<8x32xf32, #tpu.memory_space<vmem>>, vector<8x32xf32>
      tpu.vector_store %arg15[%c0_34, %c0_35], %45 {strides = array<i32>} : memref<8x32xf32, #tpu.memory_space<vmem>>, vector<8x32xf32>,
    } else {
    }
    %c0_i32_2 = arith.constant 0 : i32
    %5 = arith.cmpi eq, %arg3, %c0_i32_2 : i32
    %6 = arith.extui %5 : i1 to i32
    %c0_i32_3 = arith.constant 0 : i32
    %7 = arith.cmpi ne, %6, %c0_i32_3 : i32
    scf.if %7 {
      %c0_33 = arith.constant 0 : index
      %c0_34 = arith.constant 0 : index
      %c0_35 = arith.constant 0 : index
      %45 = vector.load %arg4[%c0_33, %c0_34, %c0_35] : memref<1x8x32xf32, #tpu.memory_space<vmem>>, vector<1x8x32xf32>
      %46 = vector.shape_cast %45 : vector<1x8x32xf32> to vector<8x32xf32>
      %c0_36 = arith.constant 0 : index
      %c0_37 = arith.constant 0 : index
      %c0_38 = arith.constant 0 : index
      %47 = vector.load %arg5[%c0_36, %c0_37, %c0_38] : memref<1x32x8xf32, #tpu.memory_space<vmem>>, vector<1x32x8xf32>
      %48 = vector.shape_cast %47 : vector<1x32x8xf32> to vector<32x8xf32>
      %cst_39 = arith.constant dense<0.000000e+00> : vector<8x8xf32>
      %49 = tpu.matmul %46, %48, %cst_39 {dimension_numbers = #tpu.dot_dimension_numbers<[1], [0], [0], [1], [0, 0, 1, 1], [], []>} : vector<8x32xf32>, vector<32x8xf32>, vector<8x8xf32> -> vector<8x8xf32>
      %cst_40 = arith.constant 0.176776692 : f32
      %50 = vector.broadcast %cst_40 : f32 to vector<8x8xf32>
      %51 = arith.mulf %49, %50 : vector<8x8xf32>
      %c0_41 = arith.constant 0 : index
      %c0_42 = arith.constant 0 : index
      %52 = vector.load %arg11[%c0_41, %c0_42] : memref<8x8xf32, #tpu.memory_space<vmem>>, vector<8x8xf32>
      tpu.vector_store %arg11[%c0_41, %c0_42], %51 {strides = array<i32>} : memref<8x8xf32, #tpu.memory_space<vmem>>, vector<8x8xf32>,
      %cst_43 = arith.constant 0xFF800000 : f32
      %53 = vector.broadcast %cst_43 : f32 to vector<8x1xf32>
      %c0_44 = arith.constant 0 : index
      %c0_45 = arith.constant 0 : index
      %54 = vector.load %arg12[%c0_44, %c0_45] : memref<8x1xf32, #tpu.memory_space<vmem>>, vector<8x1xf32>
      tpu.vector_store %arg12[%c0_44, %c0_45], %53 {strides = array<i32>} : memref<8x1xf32, #tpu.memory_space<vmem>>, vector<8x1xf32>,
      %cst_46 = arith.constant 0.000000e+00 : f32
      %55 = vector.broadcast %cst_46 : f32 to vector<8x1xf32>
      %c0_47 = arith.constant 0 : index
      %c0_48 = arith.constant 0 : index
      %56 = vector.load %arg13[%c0_47, %c0_48] : memref<8x1xf32, #tpu.memory_space<vmem>>, vector<8x1xf32>
      tpu.vector_store %arg13[%c0_47, %c0_48], %55 {strides = array<i32>} : memref<8x1xf32, #tpu.memory_space<vmem>>, vector<8x1xf32>,
      %cst_49 = arith.constant 0.000000e+00 : f32
      %57 = vector.broadcast %cst_49 : f32 to vector<8x8xf32>
      %c0_50 = arith.constant 0 : index
      %c0_51 = arith.constant 0 : index
      %58 = vector.load %arg14[%c0_50, %c0_51] : memref<8x8xf32, #tpu.memory_space<vmem>>, vector<8x8xf32>
      tpu.vector_store %arg14[%c0_50, %c0_51], %57 {strides = array<i32>} : memref<8x8xf32, #tpu.memory_space<vmem>>, vector<8x8xf32>,
    } else {
    }
    %c0 = arith.constant 0 : index
    %c0_4 = arith.constant 0 : index
    %c0_5 = arith.constant 0 : index
    %c0_6 = arith.constant 0 : index
    %8 = vector.load %arg6[%c0, %c0_4, %c0_5, %c0_6] : memref<1x1x8x8xf32, #tpu.memory_space<vmem>>, vector<1x1x8x8xf32>
    %9 = vector.shape_cast %8 : vector<1x1x8x8xf32> to vector<8x8xf32>
    %c0_7 = arith.constant 0 : index
    %c0_8 = arith.constant 0 : index
    %c0_9 = arith.constant 0 : index
    %c0_10 = arith.constant 0 : index
    %10 = vector.load %arg7[%c0_7, %c0_8, %c0_9, %c0_10] : memref<1x1x8x8xf32, #tpu.memory_space<vmem>>, vector<1x1x8x8xf32>
    %11 = vector.shape_cast %10 : vector<1x1x8x8xf32> to vector<8x8xf32>
    %c0_11 = arith.constant 0 : index
    %c0_12 = arith.constant 0 : index
    %12 = vector.load %arg11[%c0_11, %c0_12] : memref<8x8xf32, #tpu.memory_space<vmem>>, vector<8x8xf32>
    %cst = arith.constant dense<0.000000e+00> : vector<8x8xf32>
    %13 = tpu.matmul %12, %9, %cst {dimension_numbers = #tpu.dot_dimension_numbers<[1], [1], [0], [0], [0, 0, 1, 0], [], []>} : vector<8x8xf32>, vector<8x8xf32>, vector<8x8xf32> -> vector<8x8xf32>
    %c0_13 = arith.constant 0 : index
    %c0_14 = arith.constant 0 : index
    %14 = vector.load %arg12[%c0_13, %c0_14] : memref<8x1xf32, #tpu.memory_space<vmem>>, vector<8x1xf32>
    %cst_15 = arith.constant dense<0xFF800000> : vector<8xf32>
    %15 = vector.multi_reduction <maximumf>, %13, %cst_15 [1] : vector<8x8xf32> to vector<8xf32>
    %16 = vector.shape_cast %15 : vector<8xf32> to vector<8x1xf32>
    %17 = arith.maximumf %14, %16 : vector<8x1xf32>
    %c0_16 = arith.constant 0 : index
    %c0_17 = arith.constant 0 : index
    %18 = vector.load %arg12[%c0_16, %c0_17] : memref<8x1xf32, #tpu.memory_space<vmem>>, vector<8x1xf32>
    %19 = arith.subf %18, %17 : vector<8x1xf32>
    %20 = math.exp %19 : vector<8x1xf32>
    %21 = vector.broadcast %17 : vector<8x1xf32> to vector<8x8xf32>
    %22 = arith.subf %13, %21 : vector<8x8xf32>
    %23 = math.exp %22 : vector<8x8xf32>
    %c0_18 = arith.constant 0 : index
    %c0_19 = arith.constant 0 : index
    %24 = vector.load %arg13[%c0_18, %c0_19] : memref<8x1xf32, #tpu.memory_space<vmem>>, vector<8x1xf32>
    %25 = arith.mulf %20, %24 : vector<8x1xf32>
    %cst_20 = arith.constant dense<0.000000e+00> : vector<8xf32>
    %26 = vector.multi_reduction <add>, %23, %cst_20 [1] : vector<8x8xf32> to vector<8xf32>
    %27 = vector.shape_cast %26 : vector<8xf32> to vector<8x1xf32>
    %28 = arith.addf %25, %27 : vector<8x1xf32>
    %c0_21 = arith.constant 0 : index
    %c0_22 = arith.constant 0 : index
    %29 = vector.load %arg13[%c0_21, %c0_22] : memref<8x1xf32, #tpu.memory_space<vmem>>, vector<8x1xf32>
    tpu.vector_store %arg13[%c0_21, %c0_22], %28 {strides = array<i32>} : memref<8x1xf32, #tpu.memory_space<vmem>>, vector<8x1xf32>,
    %c0_23 = arith.constant 0 : index
    %c0_24 = arith.constant 0 : index
    %30 = vector.load %arg14[%c0_23, %c0_24] : memref<8x8xf32, #tpu.memory_space<vmem>>, vector<8x8xf32>
    %31 = vector.broadcast %20 : vector<8x1xf32> to vector<8x8xf32>
    %32 = arith.mulf %31, %30 : vector<8x8xf32>
    %cst_25 = arith.constant dense<0.000000e+00> : vector<8x8xf32>
    %33 = tpu.matmul %23, %11, %cst_25 {dimension_numbers = #tpu.dot_dimension_numbers<[1], [0], [0], [1], [0, 0, 1, 1], [], []>} : vector<8x8xf32>, vector<8x8xf32>, vector<8x8xf32> -> vector<8x8xf32>
    %34 = arith.addf %32, %33 : vector<8x8xf32>
    %c0_26 = arith.constant 0 : index
    %c0_27 = arith.constant 0 : index
    %35 = vector.load %arg14[%c0_26, %c0_27] : memref<8x8xf32, #tpu.memory_space<vmem>>, vector<8x8xf32>
    tpu.vector_store %arg14[%c0_26, %c0_27], %34 {strides = array<i32>} : memref<8x8xf32, #tpu.memory_space<vmem>>, vector<8x8xf32>,
    %c0_28 = arith.constant 0 : index
    %c0_29 = arith.constant 0 : index
    %36 = vector.load %arg12[%c0_28, %c0_29] : memref<8x1xf32, #tpu.memory_space<vmem>>, vector<8x1xf32>
    tpu.vector_store %arg12[%c0_28, %c0_29], %17 {strides = array<i32>} : memref<8x1xf32, #tpu.memory_space<vmem>>, vector<8x1xf32>,
    %c1_i32 = arith.constant 1 : i32
    %37 = arith.cmpi eq, %arg3, %c1_i32 : i32
    %38 = arith.extui %37 : i1 to i32
    %c0_i32_30 = arith.constant 0 : i32
    %39 = arith.cmpi ne, %38, %c0_i32_30 : i32
    scf.if %39 {
      %c0_33 = arith.constant 0 : index
      %c0_34 = arith.constant 0 : index
      %c0_35 = arith.constant 0 : index
      %45 = vector.load %arg8[%c0_33, %c0_34, %c0_35] : memref<1x8x32xf32, #tpu.memory_space<vmem>>, vector<1x8x32xf32>
      %46 = vector.shape_cast %45 : vector<1x8x32xf32> to vector<8x32xf32>
      %c0_36 = arith.constant 0 : index
      %c0_37 = arith.constant 0 : index
      %47 = vector.load %arg14[%c0_36, %c0_37] : memref<8x8xf32, #tpu.memory_space<vmem>>, vector<8x8xf32>
      %c0_38 = arith.constant 0 : index
      %c0_39 = arith.constant 0 : index
      %48 = vector.load %arg13[%c0_38, %c0_39] : memref<8x1xf32, #tpu.memory_space<vmem>>, vector<8x1xf32>
      %49 = tpu.reciprocal %48 {approx = true} : vector<8x1xf32> -> vector<8x1xf32>
      %50 = vector.broadcast %49 : vector<8x1xf32> to vector<8x8xf32>
      %51 = arith.mulf %47, %50 : vector<8x8xf32>
      %c0_40 = arith.constant 0 : index
      %c0_41 = arith.constant 0 : index
      %52 = vector.load %arg15[%c0_40, %c0_41] : memref<8x32xf32, #tpu.memory_space<vmem>>, vector<8x32xf32>
      %cst_42 = arith.constant dense<0.000000e+00> : vector<8x32xf32>
      %53 = tpu.matmul %51, %46, %cst_42 {dimension_numbers = #tpu.dot_dimension_numbers<[1], [0], [0], [1], [0, 0, 1, 1], [], []>} : vector<8x8xf32>, vector<8x32xf32>, vector<8x32xf32> -> vector<8x32xf32>
      %54 = arith.addf %52, %53 : vector<8x32xf32>
      %c0_43 = arith.constant 0 : index
      %c0_44 = arith.constant 0 : index
      %55 = vector.load %arg15[%c0_43, %c0_44] : memref<8x32xf32, #tpu.memory_space<vmem>>, vector<8x32xf32>
      tpu.vector_store %arg15[%c0_43, %c0_44], %54 {strides = array<i32>} : memref<8x32xf32, #tpu.memory_space<vmem>>, vector<8x32xf32>,
    } else {
    }
    %c3_i32 = arith.constant 3 : i32
    %40 = arith.cmpi eq, %arg2, %c3_i32 : i32
    %c1_i32_31 = arith.constant 1 : i32
    %41 = arith.cmpi eq, %arg3, %c1_i32_31 : i32
    %42 = arith.andi %40, %41 : i1
    %43 = arith.extui %42 : i1 to i32
    %c0_i32_32 = arith.constant 0 : i32
    %44 = arith.cmpi ne, %43, %c0_i32_32 : i32
    scf.if %44 {
      %c0_33 = arith.constant 0 : index
      %c0_34 = arith.constant 0 : index
      %45 = vector.load %arg15[%c0_33, %c0_34] : memref<8x32xf32, #tpu.memory_space<vmem>>, vector<8x32xf32>
      %c0_35 = arith.constant 0 : index
      %c0_36 = arith.constant 0 : index
      %46 = vector.load %arg9[%c0_35, %c0_36] : memref<1x32xf32, #tpu.memory_space<vmem>>, vector<1x32xf32>
      %47 = vector.broadcast %46 : vector<1x32xf32> to vector<8x32xf32>
      %48 = arith.addf %45, %47 : vector<8x32xf32>
      %c0_37 = arith.constant 0 : index
      %c0_38 = arith.constant 0 : index
      %c0_39 = arith.constant 0 : index
      %49 = vector.load %arg10[%c0_37, %c0_38, %c0_39] : memref<1x8x32xf32, #tpu.memory_space<vmem>>, vector<1x8x32xf32>
      %50 = vector.shape_cast %49 : vector<1x8x32xf32> to vector<8x32xf32>
      %51 = vector.shape_cast %48 : vector<8x32xf32> to vector<1x8x32xf32>
      tpu.vector_store %arg10[%c0_37, %c0_38, %c0_39], %51 {strides = array<i32>} : memref<1x8x32xf32, #tpu.memory_space<vmem>>, vector<1x8x32xf32>,
    } else {
    }
    return
  }
  func.func @transform_0(%arg0: i32, %arg1: i32, %arg2: i32, %arg3: i32) -> (i32, i32, i32) {
    %c0_i32 = arith.constant 0 : i32
    %c0_i32_0 = arith.constant 0 : i32
    return %arg0, %arg1, %c0_i32 : i32, i32, i32
  }
  func.func @transform_1(%arg0: i32, %arg1: i32, %arg2: i32, %arg3: i32) -> (i32, i32, i32) {
    %c0_i32 = arith.constant 0 : i32
    %c0_i32_0 = arith.constant 0 : i32
    %c0_i32_1 = arith.constant 0 : i32
    return %arg2, %c0_i32, %c0_i32_0 : i32, i32, i32
  }
  func.func @transform_2(%arg0: i32, %arg1: i32, %arg2: i32, %arg3: i32) -> (i32, i32, i32, i32) {
    %c0_i32 = arith.constant 0 : i32
    %c0_i32_0 = arith.constant 0 : i32
    return %arg0, %arg2, %arg3, %c0_i32 : i32, i32, i32, i32
  }
  func.func @transform_3(%arg0: i32, %arg1: i32, %arg2: i32, %arg3: i32) -> (i32, i32, i32, i32) {
    %c0_i32 = arith.constant 0 : i32
    %c0_i32_0 = arith.constant 0 : i32
    return %arg0, %arg2, %arg3, %c0_i32 : i32, i32, i32, i32
  }
  func.func @transform_4(%arg0: i32, %arg1: i32, %arg2: i32, %arg3: i32) -> (i32, i32, i32) {
    %c0_i32 = arith.constant 0 : i32
    %c0_i32_0 = arith.constant 0 : i32
    %c0_i32_1 = arith.constant 0 : i32
    return %arg2, %c0_i32, %c0_i32_0 : i32, i32, i32
  }
  func.func @transform_5(%arg0: i32, %arg1: i32, %arg2: i32, %arg3: i32) -> (i32, i32) {
    %c0_i32 = arith.constant 0 : i32
    %c0_i32_0 = arith.constant 0 : i32
    %c0_i32_1 = arith.constant 0 : i32
    return %c0_i32, %c0_i32_0 : i32, i32
  }
  func.func @transform_6(%arg0: i32, %arg1: i32, %arg2: i32, %arg3: i32) -> (i32, i32, i32) {
    %c0_i32 = arith.constant 0 : i32
    %c0_i32_0 = arith.constant 0 : i32
    return %arg0, %arg1, %c0_i32 : i32, i32, i32
  }
}

</mosaic_0001>

<bundles_post_ra>
// kernel: attention_forward.2
= control target key start
LH: loop header
LB: loop body
LE: loop exit
PB: predicated region body
PF: predicated region fallthrough
CT: control target
= control target key end

     0   :  { %s878_s15 = smov 0   ;;  %s880_s16 = smov 0   ;;  %s966_s0 = inlined_call_operand.vmem [shape: f32[2,16,32], index: 0, kind: input, shape index: {}]   ;;  %s967_s1 = inlined_call_operand.vmem [shape: f32[4,32,8], index: 1, kind: input, shape index: {}]   ;;  %s968_s2 = inlined_call_operand.vmem [shape: f32[4,32,8], index: 2, kind: input, shape index: {}]   ;;  %s969_s3 = inlined_call_operand.vmem [shape: f32[2,4,16,8], index: 3, kind: output, shape index: {0}]   ;;  %s970_s4 = inlined_call_operand.vmem [shape: f32[2,4,16,8], index: 4, kind: output, shape index: {1}]  }
   0x1   :  { %s882_s17 = smov 0   ;;  %s884_s18 = smov 0  }
   0x2   :  { %s886_s19 = smov 0   ;;  %s888_s20 = smov 0  }
   0x3   :  { %s890_s21 = smov 0  }
   0x4 LB: > { %s27_s22 = sadd.s32 1, %s836_s18  ;;  %s30_s23 = sadd.s32 1, %s840_s19  ;;  %s848_s21 = sphi %s890_s21, %s15_s21   ;;  %s844_s20 = sphi %s888_s20, %s976_s20   ;;  %s840_s19 = sphi %s886_s19, %s975_s19   ;;  %s836_s18 = sphi %s884_s18, %s974_s18   ;;  %s832_s17 = sphi %s882_s17, %s973_s17   ;;  %s828_s16 = sphi %s880_s16, %s972_s16   ;;  %s824_s15 = sphi %s878_s15, %s971_s15  }
   0x5   : > { %p28_p0 = scmp.ge.s32.totalorder %s27_s22, 4  ;;  %p672_p1 = scmp.ge.s32.totalorder %s848_s21, 1 }
   0x6   : > { %p217_p2 = scmp.lt.s32.totalorder %s848_s21, 17  ;;  %s34_s24 = sadd.s32 1, %s844_s20 }
   0x7   : > { %s978_s22 = smov (%p28_p0, %s27_s22), 0  ;;  %s980_s23 = smov (!%p28_p0, %s30_s23), %s840_s19 }
   0x8   : > { %p218_p3 = pnand %p672_p1, %p217_p2  ;;  %p32_p4 = scmp.ge.s32.totalorder %s980_s23, 2 }
   0x9   : > { %p283_p6 = scmp.lt.s32.totalorder (!%p218_p3), %s824_s15, 3  ;;  %p275_p7 = scmp.lt.s32.totalorder (!%p218_p3), %s832_s17, 1  ;;  %v850_v0 = vmov (!%p218_p3), 0.0|0.0   ;;  %vm851_vm0 = vmmov (!%p218_p3), 0   ;;  %v852_v1 = vmov (!%p218_p3), 0.0   ;;  %vm322_vm1 = vcmask (!%p218_p3), 261120  }
   0xa   : > { %s982_s23 = smov (%p32_p4, %s980_s23), 0  ;;  %s984_s24 = smov (!%p32_p4, %s34_s24), %s844_s20 }
   0xb   : > { %p36_p5 = scmp.ge.s32.totalorder %s984_s24, 2  ;;  %221 = sbr.rel (%p218_p3) target bundleno = 245 (0xf5), region = 32  ;;  %723 = vmatprep.subr.bf16.mxu0 (!%p218_p3), %v850_v0  ;;  %729 = vmatprep.subr.bf16.mxu1 (!%p218_p3), %v850_v0  ;;  %vm470_vm2 = vcmask (!%p218_p3), 64512  }
   0xc   : > { %p277_p8 = scmp.lt.s32.totalorder (!%p218_p3), %s828_s16, 1  ;;  %709 = vmatprep.mubr.msk.f32.mxu0 (!%p218_p3), %vm851_vm0, %v852_v1  ;;  %720 = vmatprep.mubr.msk.f32.mxu1 (!%p218_p3), %vm851_vm0, %v852_v1 }
   0xd   : > { %s986_s24 = smov (%p36_p5, %s984_s24), 0 }
  0x12   : > { %s988_s15 = smov (!%p283_p6, %s824_s15), 3  ;;  %s990_s17 = smov (!%p275_p7, %s832_s17), 1 }
  0x13   : > { %s689_s25 = sshll.u32 %s988_s15, 5  ;;  %s679_s26 = sshll.u32 %s988_s15, 1 }
  0x14   : > { %s287_s29 = scalar_lea.vmem %s967_s1, %s689_s25  ;;  %s292_s6 = scalar_lea.vmem %s968_s2, %s689_s25 }
  0x15   : > { %v318_v2 = vld [vmem:[%s287_s29] sm:$0xff]  ;;  %v319_v3 = vld [vmem:[%s287_s29 + $0x8] sm:$0xff]  ;;  %s992_s16 = smov (!%p277_p8, %s828_s16), 1  ;;  %v320_v7 = vld [vmem:[%s287_s29 + $0x10] sm:$0xff]  ;;  %s673_s7 = sshll.u32 %s990_s17, 1 }
  0x16   : > { %v396_v4 = vld [vmem:[%s292_s6] sm:$0xff]  ;;  %v724_v5 = vpack.c.bf16 %v319_v3, %v318_v2  ;;  %v397_v6 = vld [vmem:[%s292_s6 + $0x8] sm:$0xff]  ;;  %v321_v8 = vld [vmem:[%s287_s29 + $0x18] sm:$0xff]  ;;  %s680_s8 = sshll.u32 %s990_s17, 3  ;;  %s280_s9 = sadd.s32 %s673_s7, %s992_s16 }
  0x17   : > { %v730_v9 = vpack.c.bf16 %v397_v6, %v396_v4  ;;  %v398_v10 = vld [vmem:[%s292_s6 + $0x10] sm:$0xff]  ;;  %v399_v11 = vld [vmem:[%s292_s6 + $0x18] sm:$0xff]  ;;  %s300_s10 = sadd.s32 %s679_s26, %s992_s16  ;;  %v727_v12 = vpack.c.bf16 %v321_v8, %v320_v7  ;;  %s674_s11 = sshll.u32 %s280_s9, 3 }
  0x18   : > { %725 = vmatpush3.bf16.msra.mxu0 %v724_v5  ;;  %s302_s12 = sadd.s32 %s680_s8, %s300_s10  ;;  %v733_v13 = vpack.c.bf16 %v399_v11, %v398_v10  ;;  %s282_s15 = scalar_lea.vmem %s966_s0, %s674_s11 }
  0x19   : > { %731 = vmatpush3.bf16.msra.mxu1 %v730_v9  ;;  %726 = vmatprep.subr.bf16.mxu0 %v850_v0  ;;  %v317_v14 = vld [vmem:[%s282_s15] sm:$0xff]  ;;  %s681_s17 = sshll.u32 %s302_s12, 3 }
  0x1a   : > { %732 = vmatprep.subr.bf16.mxu1 %v850_v0  ;;  %s304_s26 = scalar_lea.vmem %s969_s3, %s681_s17  ;;  %s316_s29 = scalar_lea.vmem %s970_s4, %s681_s17 }
  0x1c   : > { %728 = vmatpush3.bf16.msra.mxu0 %v727_v12 }
  0x1d   : > { %734 = vmatpush3.bf16.msra.mxu1 %v733_v13 }
  0x1f   : > { %710 = vmatmul.mubr.msk.f32.vlgmr.msra.gmra.mrb[0].mxu0 %vm322_vm1, %v317_v14 }
  0x20   : > { %721 = vmatmul.mubr.msk.f32.vlgmr.msra.gmra.mrb[0].mxu1 %vm322_vm1, %v317_v14 }
  0xf2   : > { %v392_v15 = vpop.f32.mrb[0].mxu0 }
  0xf3   : > { %471 = vst.msk [vmem:[%s304_s26] sm:$0xff] %vm470_vm2, %v392_v15  ;;  %v466_v16 = vpop.f32.mrb[0].mxu1  ;;  %v711_v17 = vpop.f32.mrb[1].mxu0 }
  0xf4   : > { %472 = vst.msk [vmem:[%s316_s29] sm:$0xff] %vm470_vm2, %v466_v16  ;;  %v722_v18 = vpop.f32.mrb[1].mxu1 }
  0xf5 PF: > { %s15_s21 = sadd.s32 1, %s848_s21   ;;  %s971_s15 = smov %s836_s18 }
  0xf6   : > { %p12_p9 = scmp.ge.s32.totalorder %s15_s21, 18   ;;  %s972_s16 = smov %s840_s19 }
  0xf7   : > { %s973_s17 = smov %s844_s20  ;;  %s974_s18 = smov %s978_s22 }
  0xf8   : > { %s975_s19 = smov %s982_s23  ;;  %s976_s20 = smov %s986_s24 }
  0xf9   :  { %14 = sbr.rel (!%p12_p9) target bundleno = 4 (0x4), region = 80 }

// kernel: attention_forward.3
= control target key start
LH: loop header
LB: loop body
LE: loop exit
PB: predicated region body
PF: predicated region fallthrough
CT: control target
= control target key end

     0   :  { %s1590_s0 = inlined_call_operand.vmem [shape: f32[2,16,32], index: 0, kind: input, shape index: {}]   ;;  %s1591_s1 = inlined_call_operand.vmem [shape: f32[4,32,8], index: 1, kind: input, shape index: {}]   ;;  %s1592_s2 = inlined_call_operand.vmem [shape: f32[2,4,16,8], index: 2, kind: input, shape index: {}]   ;;  %s1593_s3 = inlined_call_operand.vmem [shape: f32[2,4,16,8], index: 3, kind: input, shape index: {}]   ;;  %s1594_s4 = inlined_call_operand.vmem [shape: f32[4,8,32], index: 4, kind: input, shape index: {}]   ;;  %s1595_s5 = inlined_call_operand.vmem [shape: f32[1,32], index: 5, kind: input, shape index: {}]   ;;  %s1596_s6 = inlined_call_operand.hbm [shape: f32[2,16,32], index: 6, kind: output, shape index: {}]  }
   0x1   :  { %1614 = sst [smem:[#allocation26_spill]] %s1590_s0 }
   0x2   :  { %1615 = sst [smem:[#allocation27_spill]] %s1596_s6 }
   0x3   :  { %11 = vsyncpa [#allocation8], 0 }
   0x4   :  { %13 = vsyncpa [#allocation8 + $0x1], 0  ;;  %s1357_s21 = smov 0   ;;  %s1359_s22 = smov 0  }
   0x5   :  { %s1361_s23 = smov 0   ;;  %s1363_s24 = smov 0  }
   0x6   :  { %s1365_s25 = smov 0   ;;  %s1367_s26 = smov 0  }
   0x7   :  { %s1369_s27 = smov 0   ;;  %s1371_s28 = smov 0  }
   0x8   :  { %s1373_s29 = smov 0   ;;  %s1375_s30 = smov 0  }
   0x9   :  { %s1377_s7 = smov 0   ;;  %s1379_s8 = smov 0  }
   0xa LB: > { %1616 = sst [smem:[#allocation10_spill]] %s1264_s21  ;;  %s985_s9 = sadd.s32 4294967295, %s1308_s8   ;;  %s1308_s8 = sphi %s1379_s8, %s19_s8   ;;  %s1304_s7 = sphi %s1377_s7, %s1653_s7   ;;  %s1300_s30 = sphi %s1375_s30, %s1652_s30   ;;  %s1296_s29 = sphi %s1373_s29, %s1651_s29   ;;  %s1292_s28 = sphi %s1371_s28, %s1650_s28   ;;  %s1288_s27 = sphi %s1369_s27, %s1649_s27   ;;  %s1284_s26 = sphi %s1367_s26, %s1648_s26   ;;  %s1280_s25 = sphi %s1365_s25, %s1647_s25   ;;  %s1276_s24 = sphi %s1363_s24, %s1646_s24   ;;  %s1272_s23 = sphi %s1361_s23, %s1645_s23   ;;  %s1268_s22 = sphi %s1359_s22, %s1644_s22   ;;  %s1264_s21 = sphi %s1357_s21, %s1643_s21  }
   0xb   : > { %1617 = sst [smem:[#allocation11_spill]] %s1268_s22  ;;  %s986_s10 = sadd.s32 4294967294, %s1308_s8  }
   0xc   : > { %1618 = sst [smem:[#allocation12_spill]] %s1272_s23  ;;  %s34_s11 = sadd.s32 1, %s1292_s28 }
   0xd   : > { %1619 = sst [smem:[#allocation13_spill]] %s1284_s26  ;;  %p35_p0 = scmp.ge.s32.totalorder %s34_s11, 2 }
   0xe   : > { %1620 = sst [smem:[#allocation14_spill]] %s1292_s28  ;;  %s37_s12 = sadd.s32 1, %s1296_s29 }
   0xf   : > { %1621 = sst [smem:[#allocation15_spill]] %s1296_s29  ;;  %s41_s13 = sadd.s32 1, %s1300_s30 }
  0x10   : > { %1622 = sst [smem:[#allocation16_spill]] %s1300_s30  ;;  %s45_s14 = sadd.s32 1, %s1304_s7 }
  0x11   : > { %1623 = sst [smem:[#allocation17_spill]] %s1304_s7  ;;  %s1655_s11 = smov (%p35_p0, %s34_s11), 0 }
  0x12   : > { %1624 = sst [smem:[#allocation18_spill]] %s1308_s8  ;;  %s1657_s12 = smov (!%p35_p0, %s37_s12), %s1296_s29 }
  0x13   : > { %1625 = sst [smem:[#allocation19_spill]] %s1655_s11  ;;  %p225_p1 = scmp.ne.s32.totalorder %s1272_s23, %s1268_s22 }
  0x14   : > { %p226_p2 = scmp.eq.s32.totalorder %s985_s9, 31  ;;  %p39_p3 = scmp.ge.s32.totalorder %s1657_s12, 4 }
  0x15   : > { %p231_p4 = scmp.ne.s32.totalorder %s1268_s22, %s1264_s21  ;;  %p232_p6 = scmp.eq.s32.totalorder %s986_s10, 31 }
  0x16   : > { %p1430_p5 = por %p226_p2, %p225_p1  ;;  %s1659_s12 = smov (%p39_p3, %s1657_s12), 0 }
  0x17   : > { %1628 = sst [smem:[#allocation21_spill]] %s1659_s12  ;;  %s1661_s13 = smov (!%p39_p3, %s41_s13), %s1300_s30 }
  0x18   : > { %s1626_s15 = scalar_select %p1430_p5, 1, 0 }
  0x19   : > { %p1437_p7 = por %p232_p6, %p231_p4  ;;  %p989_p8 = scmp.ge.s32.totalorder %s1308_s8, 1 }
  0x1a   : > { %1627 = sst [smem:[#allocation20_spill]] %s1626_s15  ;;  %p43_p9 = scmp.ge.s32.totalorder %s1661_s13, 2 }
  0x1b   : > { %s1629_s16 = scalar_select %p1437_p7, 1, 0 }
  0x1c   : > { %p309_p10 = scmp.lt.s32.totalorder %s1308_s8, 33  ;;  %s1663_s13 = smov (%p43_p9, %s1661_s13), 0 }
  0x1d   : > { %1630 = sst [smem:[#allocation22_spill]] %s1629_s16  ;;  %s1665_s14 = smov (!%p43_p9, %s45_s14), %s1304_s7 }
  0x1e   : > { %1631 = sst [smem:[#allocation23_spill]] %s1663_s13  ;;  %p310_p11 = pnand %p989_p8, %p309_p10 }
  0x1f   : > { %p47_p12 = scmp.ge.s32.totalorder %s1665_s14, 2  ;;  %s211_s17 = ssub.s32 %s1300_s30, %s1663_s13 }
  0x20   : > { %s215_s20 = sadd.s32 1, %s1272_s23  ;;  %s1601_s10 = sand.u32 (!%p310_p11), 1, %s1268_s22  }
  0x21   : > { %s1667_s14 = smov (%p47_p12, %s1665_s14), 0  ;;  %p375_p0 = scmp.lt.s32.totalorder (!%p310_p11), %s1288_s27, 1 }
  0x22   : > { %1632 = sst [smem:[#allocation24_spill]] %s1667_s14  ;;  %s210_s18 = ssub.s32 %s1304_s7, %s1667_s14 }
  0x23   : > { %s212_s19 = sor.u32 %s211_s17, %s210_s18  ;;  %313 = sbr.rel (%p310_p11) target bundleno = 1343 (0x53f), region = 44 }
  0x24   : > { %p213_p13 = scmp.eq.s32.totalorder %s212_s19, 0  ;;  %s1460_s17 = sshll.u32 (!%p310_p11), %s1601_s10, 3 }
  0x25   : > { %p377_p1 = scmp.lt.s32.totalorder (!%p310_p11), %s1284_s26, 1  ;;  %p383_p2 = scmp.lt.s32.totalorder (!%p310_p11), %s1280_s25, 3 }
  0x26   : > { %s1454_s9 = scalar_select %p213_p13, %s1272_s23, %s215_s20  }
  0x27   : > { %p392_p3 = scmp.lt.s32.totalorder (!%p310_p11), %s1276_s24, 1  ;;  %p416_p4 = scmp.eq.s32.totalorder (!%p310_p11), %s1280_s25, 0 }
  0x28   : > { %1633 = sst [smem:[#allocation25_spill]] %s1454_s9  ;;  %s1634_s0 = sld [smem:[#allocation26_spill]] (!%p310_p11) }
  0x29   : > { %p417_p6 = scmp.eq.s32.totalorder (!%p310_p11), %s1276_s24, 0  ;;  %s374_s23 = scalar_lea.vmem (!%p310_p11), [#allocation7], %s1460_s17 }
  0x2a   : > { %s376_s18 = scalar_select %p375_p0, %s1288_s27, 1 }
  0x2b   : > { %s378_s19 = scalar_select %p377_p1, %s1284_s26, 1 }
  0x2c   : > { %s991_s20 = sshll.u32 %s376_s18, 1  ;;  %s996_s13 = sshll.u32 %s376_s18, 3 }
  0x2d   : > { %s380_s14 = sadd.s32 %s991_s20, %s378_s19  ;;  %p418_p8 = pnand %p417_p6, %p416_p4 }
  0x2e   : > { %s992_s12 = sshll.u32 %s380_s14, 3  ;;  %vm422_vm0 = vcmask (!%p418_p8), 261120   ;;  %v1310_v0 = vmov (!%p418_p8), 0.0  }
  0x2f   : > { %s1471_s30 = scalar_lea.vmem %s1634_s0, %s992_s12  ;;  %423 = vst.msk [vmem:[#allocation6] sm:$0xff] (!%p418_p8), %vm422_vm0, %v1310_v0 }
  0x30   : > { %s384_s10 = scalar_select %p383_p2, %s1280_s25, 3 }
  0x31   : > { %s393_s29 = scalar_select %p392_p3, %s1276_s24, 1 }
  0x32   : > { %s1015_s28 = sshll.u32 %s384_s10, 5  ;;  %s995_s9 = sshll.u32 %s384_s10, 1 }
  0x33   : > { %s387_s19 = scalar_lea.vmem %s1591_s1, %s1015_s28  ;;  %s395_s18 = sadd.s32 %s995_s9, %s393_s29 }
  0x34   : > { %s397_s14 = sadd.s32 %s996_s13, %s395_s18  ;;  %s1001_s20 = sshll.u32 %s384_s10, 3 }
  0x35   : > { %s997_s21 = sshll.u32 %s397_s14, 3  ;;  %s1482_s7 = scalar_lea.vmem %s1594_s4, %s1001_s20 }
  0x36   : > { %s1487_s0 = scalar_lea.vmem %s1592_s2, %s997_s21  ;;  %s1492_s26 = scalar_lea.vmem %s1593_s3, %s997_s21 }
  0x37   : > { %421 = sbr.rel (%p418_p8) target bundleno = 62 (0x3e), region = 48 }
  0x3e PF: > { %p1002_p9 = scmp.ne.s32.totalorder %s1276_s24, 0 }
  0x3f   : > { %v428_v1 = vld [vmem:[%s387_s19] sm:$0xff] (!%p1002_p9)  ;;  %v429_v2 = vld [vmem:[%s387_s19 + $0x8] sm:$0xff] (!%p1002_p9)  ;;  %v430_v3 = vld [vmem:[%s387_s19 + $0x10] sm:$0xff] (!%p1002_p9)  ;;  %v1311_v4 = vmov (!%p1002_p9), 0.0|0.0   ;;  %vm1312_vm1 = vmmov (!%p1002_p9), 0   ;;  %v1313_v7 = vmov (!%p1002_p9), 0.0  }
  0x40   : > { %426 = sbr.rel (%p1002_p9) target bundleno = 288 (0x120), region = 52  ;;  %1053 = vmatprep.subr.bf16.mxu0 (!%p1002_p9), %v1311_v4  ;;  %v1054_v5 = vpack.c.bf16 (!%p1002_p9), %v429_v2, %v428_v1  ;;  %v431_v6 = vld [vmem:[%s387_s19 + $0x18] sm:$0xff] (!%p1002_p9)  ;;  %1035 = vmatprep.mubr.msk.f32.mxu0 (!%p1002_p9), %vm1312_vm1, %v1313_v7  ;;  %vm509_vm2 = vcmask (!%p1002_p9), 7168   ;;  %v1314_v8 = vmov (!%p1002_p9), -inf   ;;  %v427_v10 = vld [vmem:[%s1471_s30] sm:$0xff] (!%p1002_p9)  ;;  %vm432_vm3 = vcmask (!%p1002_p9), 261120  }
  0x41   : > { %510 = vst.msk [vmem:[#allocation3] sm:$0xff] (!%p1002_p9), %vm509_vm2, %v1314_v8  ;;  %511 = vst.msk [vmem:[#allocation4] sm:$0xff] (!%p1002_p9), %vm509_vm2, %v1313_v7  ;;  %v1057_v9 = vpack.c.bf16 (!%p1002_p9), %v431_v6, %v430_v3  ;;  %vm507_vm4 = vcmask (!%p1002_p9), 64512  }
  0x42   : > { %1055 = vmatpush3.bf16.msra.mxu0 (!%p1002_p9), %v1054_v5  ;;  %512 = vst.msk [vmem:[#allocation5] sm:$0xff] (!%p1002_p9), %vm507_vm4, %v1313_v7 }
  0x43   : > { %1056 = vmatprep.subr.bf16.mxu0 (!%p1002_p9), %v1311_v4 }
  0x46   : > { %1058 = vmatpush3.bf16.msra.mxu0 (!%p1002_p9), %v1057_v9 }
  0x49   : > { %1036 = vmatmul.mubr.msk.f32.vlgmr.msra.gmra.mrb[0].mxu0 %vm432_vm3, %v427_v10 }
 0x11c   : > { %v502_v11 = vpop.f32.mrb[0].mxu0 }
 0x11d   : > { %v506_v12 = vmul.f32 0.17677669, %v502_v11  ;;  %v1037_v13 = vpop.f32.mrb[1].mxu0 }
 0x11f   : > { %508 = vst.msk [vmem:[#allocation2] sm:$0xff] %vm507_vm4, %v506_v12 }
 0x120 PF: > { %v513_v14 = vld [vmem:[%s1487_s0] sm:$0xff]  ;;  %vm516_vm5 = vcmask 64512   ;;  %v1315_v15 = vmov 0.0   ;;  %vm1316_vm6 = vmmov 0   ;;  %v1317_v20 = vmov 0   ;;  %p700_p10 = scmp.eq.s32.totalorder %s1276_s24, 1 }
 0x121   : > { %1038 = vmatprep.subr.mxu0 %v1315_v15  ;;  %1040 = vmatprep.mubr.msk.f32.mxu0 %vm1316_vm6, %v1315_v15  ;;  %v593_v21 = vld [vmem:[#allocation3] sm:$0xff]  ;;  %vm615_vm7 = vcmask 7168   ;;  %v514_v25 = vld [vmem:[%s1492_s26] sm:$0xff]  ;;  %v609_v33 = vld [vmem:[#allocation4] sm:$0xff]  ;;  %p1007_p11 = scmp.ne.s32.totalorder %s1276_s24, 1 }
 0x122   : > { %1039 = vmatpush3.xpose.msk.msra.mxu0 %vm516_vm5, %v513_v14  ;;  %1043 = vmatprep.subr.mxu1 %v1315_v15  ;;  %v617_v37 = vld [vmem:[#allocation5] sm:$0xff]  ;;  %v1318_v44 = vmov (!%p1007_p11), 0   ;;  %v1319_v46 = vmov (!%p1007_p11), 0.0   ;;  %v704_v47 = vld [vmem:[%s1482_s7] sm:$0xff] (!%p1007_p11)  ;;  %vm1320_vm8 = vmmov (!%p1007_p11), 0   ;;  %vm789_vm9 = vcmask (!%p1007_p11), 261120  }
 0x123   : > { %1045 = vmatprep.mubr.msk.f32.mxu1 %vm1316_vm6, %v1315_v15  ;;  %1173 = vset.pattern.permute.xlu0 %v1317_v20  ;;  %v714_v51 = vld [vmem:[#allocation6] sm:$0xff] (!%p1007_p11) }
 0x124   : > { %1174 = vset.pattern.permute.xlu1 %v1317_v20  ;;  %1044 = vmatpush3.msra.mxu1 %v514_v25 }
 0x125   : > { %1048 = vmatprep.subr.mxu0 (!%p1007_p11), %v1319_v46 }
 0x126   : > { %v515_v16 = vld [vmem:[#allocation2] sm:$0xff] }
 0x127   : > { %1041 = vmatmul.mubr.msk.f32.vlgmr.msra.gmra.mrb[0].mxu0 %vm516_vm5, %v515_v16 }
 0x128   : > { %1049 = vmatpush3.msra.mxu0 (!%p1007_p11), %v704_v47  ;;  %1050 = vmatprep.mubr.msk.f32.mxu0 (!%p1007_p11), %vm1320_vm8, %v1319_v46 }
 0x1fa   : > { %v589_v17 = vpop.f32.mrb[0].mxu0 }
 0x1fb   : > { %v1042_v18 = vpop.f32.mrb[1].mxu0  ;;  %v594_v19 = vsel %vm516_vm5, %v589_v17, -inf }
 0x1fc   : > { %595 = vmax.xlane.f32.xlu0 %v594_v19 }
 0x289   : > { %v596_v22 = vpop.xlane.xlu0 %595 }
 0x28a   : > { %v597_v23 = vmax.f32 %v593_v21, %v596_v22 }
 0x28c   : > { %v598_v24 = vsub.f32 %v593_v21, %v597_v23  ;;  %699 = vst.msk [vmem:[#allocation3] sm:$0xff] %vm615_vm7, %v597_v23  ;;  %603 = vperm.xlu0 %1173, %v597_v23  }
 0x28e   : > { %v599_v31 = vmul.f32 1.442695, %v598_v24 }
 0x290   : > { %1179 = vset.pattern.permute.xlu0 (!%p1007_p11), %v1318_v44 }
 0x30b   : > { %v604_v26 = vpop.permute.xlu0 %603 }
 0x30c   : > { %v606_v27 = vsub.f32 %v589_v17, %v604_v26 }
 0x30e   : > { %v607_v28 = vmul.f32 1.442695, %v606_v27 }
 0x310   : > { %1175 = vpow2.f32 %v607_v28 }
 0x311   : > { %1177 = vpow2.f32 %v599_v31 }
 0x31a   : > { %v1176_v29 = vpop.eup %1175 }
 0x31b   : > { %1046 = vmatmul.mubr.msk.f32.vlgmr.msra.gmra.mrb[0].mxu1 %vm516_vm5, %v1176_v29  ;;  %v611_v30 = vsel %vm516_vm5, %v1176_v29, 0.0  ;;  %v1178_v32 = vpop.eup %1177 }
 0x31c   : > { %612 = vadd.xlane.f32.xlu1 %v611_v30  ;;  %v610_v34 = vmul.f32 %v1178_v32, %v609_v33 }
 0x32d   : > { %620 = vperm.xlu1 %1174, %v1178_v32  }
 0x3a9   : > { %v613_v35 = vpop.xlane.xlu1 %612 }
 0x3aa   : > { %v614_v36 = vadd.f32 %v613_v35, %v610_v34 }
 0x3ac   : > { %616 = vst.msk [vmem:[#allocation4] sm:$0xff] %vm615_vm7, %v614_v36 }
 0x3ad   : > { %v621_v38 = vpop.permute.xlu1 %620 }
 0x3ae   : > { %v623_v39 = vmul.f32 %v621_v38, %v617_v37 }
 0x3b3   : > { %v706_v43 = vld [vmem:[#allocation4] sm:$0xff] (!%p1007_p11) }
 0x3b4   : > { %1180 = vrcp.f32 (!%p1007_p11), %v706_v43 }
 0x3be   : > { %v1181_v45 = vpop.eup (!%p1007_p11), %1180 }
 0x3bf   : > { %710 = vperm.xlu0 (!%p1007_p11), %1179, %v1181_v45  }
 0x3eb   : > { %703 = sbr.rel (%p1007_p11) target bundleno = 1304 (0x518), region = 56 }
 0x3ee   : > { %v693_v40 = vpop.f32.mrb[0].mxu1 }
 0x3ef   : > { %v697_v41 = vadd.f32 %v693_v40, %v623_v39  ;;  %v1047_v42 = vpop.f32.mrb[1].mxu1 }
 0x3f1   : > { %698 = vst.msk [vmem:[#allocation5] sm:$0xff] %vm516_vm5, %v697_v41 }
 0x3f8   : > { %v705_v48 = vld [vmem:[#allocation5] sm:$0xff] }
 0x43e   : > { %v711_v49 = vpop.permute.xlu0 %710 }
 0x43f   : > { %v713_v50 = vmul.f32 %v711_v49, %v705_v48 }
 0x441   : > { %1051 = vmatmul.mubr.msk.f32.vlgmr.msra.gmra.mrb[0].mxu0 %vm516_vm5, %v713_v50 }
 0x514   : > { %v784_v52 = vpop.f32.mrb[0].mxu0 }
 0x515   : > { %v788_v53 = vadd.f32 %v784_v52, %v714_v51  ;;  %v1052_v54 = vpop.f32.mrb[1].mxu0 }
 0x517   : > { %790 = vst.msk [vmem:[#allocation6] sm:$0xff] %vm789_vm9, %v788_v53 }
 0x518 PF: > { %p791_p12 = scmp.eq.s32.totalorder %s1280_s25, 3 }
 0x51a   : > { %p792_p13 = pnand %p791_p12, %p700_p10 }
 0x51b   : > { %v1009_v56 = vld [vmem:[%s1595_s5] ss:$0 sm:$0xff] (!%p792_p13)  ;;  %vm805_vm10 = vcmask (!%p792_p13), 261120  }
 0x51c   : > { %795 = sbr.rel (%p792_p13) target bundleno = 1315 (0x523), region = 60 }
 0x51e   : > { %v796_v55 = vld [vmem:[#allocation6] sm:$0xff] (!%p792_p13) }
 0x51f   : > { %v804_v57 = vadd.f32 (!%p792_p13), %v1009_v56, %v796_v55 }
 0x521   : > { %806 = vst.msk [vmem:[%s374_s23] sm:$0xff] (!%p792_p13), %vm805_vm10, %v804_v57 }
 0x523 PF: > { %s1635_s21 = sld [smem:[#allocation13_spill]]  ;;  %s1636_s22 = sld [smem:[#allocation11_spill]] }
 0x524   : > { %s1011_s25 = sshll.u32 %s1288_s27, 1  ;;  %s823_s28 = sshll.u32 %s374_s23, 4  ;;  %s1527_s28 = int_to_ptr.vmem [resolvable:$true] %s823_s28 }
 0x525   : > { %s1638_s13 = sld [smem:[#allocation27_spill]]  ;;  %s1182_s10 = scalar_lea.vmem %s1527_s28, 128 }
 0x526   : > { %p1183_p0 = scmp.ne.s32.totalorder %s1527_s28, %s1182_s10  ;;  %s1321_s27 = smov [#allocation7]  }
 0x527   : > { %s1186_s17 = sshll.u32 %s1321_s27, 4  ;;  %s1187_s17 = int_to_ptr.vmem [resolvable:$false] %s1186_s17 }
 0x528   : > { %p1184_p1 = pnand %p1183_p0, %p1430_p5  ;;  %s1188_s19 = scalar_lea.vmem %s1187_s17, 256 }
 0x529   : > { %s819_s24 = sadd.s32 %s1635_s21, %s1011_s25  ;;  %s1639_s16 = sand.u32 1, %s1636_s22  }
 0x52a   : > { %s1012_s29 = sshll.u32 %s819_s24, 7  ;;  %s808_s9 = scalar_lea.sflag [#allocation8], %s1639_s16 }
 0x52b   : > { %s821_s15 = scalar_lea.hbm %s1638_s13, %s1012_s29  ;;  %p1185_p2 = pneg %p1184_p1 }
 0x52c   : > { %p1189_p3 = scmp.lt.s32.totalorder %s1527_s28, %s1187_s17  ;;  %p1190_p4 = scmp.lt.s32.totalorder %s1188_s19, %s1182_s10 }
 0x52e   : > { %p1191_p6 = por %p1190_p4, %p1189_p3 }
 0x530   : > { %p1192_p8 = pnand %p1191_p6, %p1185_p2 }
 0x532   : > { %1195 = shalt.err (!%p1192_p8)
}
 0x533   : > { %s1196_s18 = scalar_lea.hbm %s821_s15, 128  ;;  %s1200_s7 = scalar_lea.hbm %s1638_s13, 512 }
 0x534   : > { %p1197_p9 = scmp.ne.s32.totalorder %s821_s15, %s1196_s18  ;;  %p1201_p12 = scmp.lt.u32.totalorder %s821_s15, %s1638_s13 }
 0x535   : > { %p1202_p13 = scmp.lt.u32.totalorder %s1200_s7, %s1196_s18  ;;  %p1204_p1 = scmp.lt.u32.totalorder %s1196_s18, %s821_s15 }
 0x536   : > { %p1198_p10 = pnand %p1197_p9, %p1430_p5 }
 0x537   : > { %p1203_p0 = por %p1202_p13, %p1201_p12 }
 0x538   : > { %p1199_p11 = pneg %p1198_p10 }
 0x539   : > { %p1205_p3 = por %p1204_p1, %p1203_p0 }
 0x53b   : > { %p1206_p2 = pnand %p1205_p3, %p1199_p11 }
 0x53d   : > { %1209 = shalt.err (!%p1206_p2)
}
 0x53e   : > { %1059 = dma.vmem_to_hbm [thread:$0]  (%p1430_p5), %s1527_s28, 128, %s821_s15, %s808_s9  }
 0x53f PF: > { %s1640_s23 = sld [smem:[#allocation18_spill]]  ;;  %s1641_s0 = sld [smem:[#allocation10_spill]] }
 0x545   : > { %p1065_p4 = scmp.ge.s32.totalorder %s1640_s23, 2  ;;  %s835_s21 = sand.u32 1, %s1641_s0  }
 0x546   : > { %s836_s22 = scalar_lea.sflag [#allocation8], %s835_s21 }
 0x547   : > { %p1062_p6 = pnand %p1065_p4, %p1437_p7 }
 0x549   : > { %1259 = dma.done.wait (!%p1062_p6), %s836_s22, 128  }
 0x54a   : > { %1261 = vsyncadd (!%p1062_p6), %s836_s22, 4294967168  ;;  %s19_s8 = sadd.s32 1, %s1640_s23   ;;  %s1643_s21 = sld [smem:[#allocation11_spill]] }
 0x54b   : > { %p16_p8 = scmp.ge.s32.totalorder %s19_s8, 34   ;;  %s1644_s22 = sld [smem:[#allocation12_spill]] }
 0x54c   : > { %s1645_s23 = sld [smem:[#allocation25_spill]]  ;;  %s1647_s25 = sld [smem:[#allocation15_spill]] }
 0x54d   : > { %s1646_s24 = sld [smem:[#allocation14_spill]]  ;;  %s1648_s26 = sld [smem:[#allocation16_spill]] }
 0x54e   : > { %s1649_s27 = sld [smem:[#allocation17_spill]]  ;;  %s1650_s28 = sld [smem:[#allocation19_spill]] }
 0x54f   : > { %s1651_s29 = sld [smem:[#allocation21_spill]]  ;;  %s1652_s30 = sld [smem:[#allocation23_spill]] }
 0x550   : > { %s1653_s7 = sld [smem:[#allocation24_spill]]  ;;  %18 = sbr.rel (!%p16_p8) target bundleno = 10 (0xa), region = 107 }
 0x557   :  { %841 = vsyncpa [#allocation8], 1 }
 0x558   :  { %843 = vsyncpa [#allocation8 + $0x1], 1 }

</bundles_post_ra>
